<compile_context>
chip_gen: v5e
topology: v5e:2x2
jax: 0.10.0
libtpu: 0.0.40
codegen_flags: <defaults>
</compile_context>

<pallas_src>
import functools

import jax
import jax.numpy as jnp
from jax.experimental import pallas as pl
from jax.experimental.pallas import tpu as pltpu

_LANE = 128      # lane width: pad feature dims to a multiple of this
_SUBLANE = 8     # sublane width: batch tiles are multiples of this
_MAX_BATCH_TILE = 256   # rows per grid step for large batches


def _round_up(n, m):
    return ((n + m - 1) // m) * m


def _apply_act(y, act):
    if act == "relu":
        return jnp.maximum(y, 0.0)
    if act == "tanh":
        return jnp.tanh(y)
    if act == "sigmoid":
        return jax.nn.sigmoid(y)
    if act == "identity":
        return y
    raise ValueError(f"unknown activation: {act}")


def mlp_fused_kernel(*refs, acts):
    """refs = (x_ref, w0_ref, b0_ref, w1_ref, b1_ref, ..., o_ref).

    One batch-tile of the full MLP: L fused (MXU matmul + bias + activation) stages,
    unrolled statically. Intermediates stay VMEM-resident; only the final tile is stored.
    """
    x_ref = refs[0]
    o_ref = refs[-1]
    wb_refs = refs[1:-1]

    h = x_ref[...]
    for i, act in enumerate(acts):
        w = wb_refs[2 * i][...]       # (Din_pad, Dout_pad), full-extent, VMEM-resident
        b = wb_refs[2 * i + 1][...]   # (1, Dout_pad) — broadcasts over batch rows
        y = jnp.dot(h, w,
                    preferred_element_type=jnp.float32,
                    precision=jax.lax.Precision.HIGHEST)
        h = _apply_act(y + b, act)
    o_ref[...] = h.astype(o_ref.dtype)


def mlp_forward(x, padded_params, acts, out_dim):
    """Run the fused MLP. x: (M, D0) f32. Returns (M, out_dim) f32."""
    M, D0 = x.shape
    D0p = padded_params[0][0].shape[0]
    DLp = padded_params[-1][0].shape[1]

    # Batch tile: multiple of the sublane width; large batches get _MAX_BATCH_TILE rows/step.
    tm = min(_round_up(max(M, _SUBLANE), _SUBLANE), _MAX_BATCH_TILE)
    Mp = _round_up(max(M, tm), tm)
    n_m = Mp // tm

    # Zero-pad the input to the (sublane, lane)-aligned shape the kernel expects.
    x_p = jnp.zeros((Mp, D0p), x.dtype).at[:M, :D0].set(x)

    flat_params = []
    in_specs = [pl.BlockSpec((tm, D0p), lambda i: (i, 0))]
    for w, b in padded_params:
        flat_params.append(w)
        flat_params.append(b)
        # Constant index_map: weights/bias blocks stay resident in VMEM across grid steps.
        in_specs.append(pl.BlockSpec(w.shape, lambda i: (0, 0)))
        in_specs.append(pl.BlockSpec(b.shape, lambda i: (0, 0)))

    out_p = pl.pallas_call(
        functools.partial(mlp_fused_kernel, acts=tuple(acts)),
        out_shape=jax.ShapeDtypeStruct((Mp, DLp), x.dtype),
        grid=(n_m,),
        in_specs=in_specs,
        out_specs=pl.BlockSpec((tm, DLp), lambda i: (i, 0)),
        compiler_params=pltpu.CompilerParams(
            dimension_semantics=("parallel",)),
    )(x_p, *flat_params)

    # Strip padding back to the logical output shape.
    return out_p[:M, :out_dim]


class MLPPallas:
    """JAX/Pallas port of the PyTorch MLP module.

    dimensions: list of layer widths [d0, d1, ..., dL]
    phi: list of activation names, one per layer (len = L)
    """

    def __init__(self, dimensions, batch_size, phi, key):
        assert len(phi) == len(dimensions) - 1
        self.dimensions = list(dimensions)
        self.batch_size = batch_size
        self.phi = list(phi)

        self.params = []          # logical (unpadded) params, for the reference
        self.padded_params = []   # lane-padded params fed to the kernel
        for din, dout in zip(dimensions[:-1], dimensions[1:]):
            key, kw, kb = jax.random.split(key, 3)
            # Deterministic init mimicking nn.Linear default: U(-1/sqrt(in), 1/sqrt(in)).
            # Stored as (in, out) so y = x @ W + b  (== PyTorch x @ W.T + b).
            bound = 1.0 / (din ** 0.5)
            w = jax.random.uniform(kw, (din, dout), jnp.float32, -bound, bound)
            b = jax.random.uniform(kb, (dout,), jnp.float32, -bound, bound)
            self.params.append((w, b))

            din_p = _round_up(din, _LANE)
            dout_p = _round_up(dout, _LANE)
            w_p = jnp.zeros((din_p, dout_p), jnp.float32).at[:din, :dout].set(w)
            b_p = jnp.zeros((1, dout_p), jnp.float32).at[0, :dout].set(b)
            self.padded_params.append((w_p, b_p))

    def __call__(self, x):
        return mlp_forward(x, self.padded_params, self.phi, self.dimensions[-1])

    def reference(self, x):
        # Pure-JAX reference (no Pallas) for validation.
        for (w, b), act in zip(self.params, self.phi):
            y = jnp.dot(x, w, precision=jax.lax.Precision.HIGHEST) + b
            x = _apply_act(y, act)
        return x


if __name__ == "__main__":
    key = jax.random.PRNGKey(0)
    key, kx, kp = jax.random.split(key, 3)

    batch_size = 8
    dimensions = [32, 64, 48, 16]          # 3 Linear layers
    phi = ["tanh", "relu", "identity"]     # one activation per layer

    model = MLPPallas(dimensions, batch_size, phi, kp)

    x = jax.random.normal(kx, (batch_size, dimensions[0]), jnp.float32)

    out = model(x)
    out = jax.block_until_ready(out)

    ref = model.reference(x)
    assert out.shape == (batch_size, dimensions[-1])
    assert jnp.allclose(out, ref, atol=1e-5, rtol=1e-5), "mismatch vs JAX reference"

    print("KERNEL_OK")
</pallas_src>

<mosaic_0001>
module attributes {stable_mosaic.version = 11 : i64} {
  func.func @mlp_fused_kernel(%arg0: i32, %arg1: memref<8x128xf32, #tpu.memory_space<vmem>>, %arg2: memref<128x128xf32, #tpu.memory_space<vmem>>, %arg3: memref<1x128xf32, #tpu.memory_space<vmem>>, %arg4: memref<128x128xf32, #tpu.memory_space<vmem>>, %arg5: memref<1x128xf32, #tpu.memory_space<vmem>>, %arg6: memref<128x128xf32, #tpu.memory_space<vmem>>, %arg7: memref<1x128xf32, #tpu.memory_space<vmem>>, %arg8: memref<8x128xf32, #tpu.memory_space<vmem>>) attributes {dimension_semantics = [#tpu.dimension_semantics<parallel>], iteration_bounds = array<i64: 1>, scalar_prefetch = 0 : i64, scratch_operands = 0 : i64, tpu.core_type = #tpu.core_type<tc>, window_params = [{transform_indices = @transform_0, window_bounds = array<i64: 8, 128>}, {pipeline_mode = #tpu.pipeline_mode<synchronous>, transform_indices = @transform_1, window_bounds = array<i64: 128, 128>}, {pipeline_mode = #tpu.pipeline_mode<synchronous>, transform_indices = @transform_2, window_bounds = array<i64: 1, 128>}, {pipeline_mode = #tpu.pipeline_mode<synchronous>, transform_indices = @transform_3, window_bounds = array<i64: 128, 128>}, {pipeline_mode = #tpu.pipeline_mode<synchronous>, transform_indices = @transform_4, window_bounds = array<i64: 1, 128>}, {pipeline_mode = #tpu.pipeline_mode<synchronous>, transform_indices = @transform_5, window_bounds = array<i64: 128, 128>}, {pipeline_mode = #tpu.pipeline_mode<synchronous>, transform_indices = @transform_6, window_bounds = array<i64: 1, 128>}, {transform_indices = @transform_7, window_bounds = array<i64: 8, 128>}]} {
    %c0 = arith.constant 0 : index
    %c0_0 = arith.constant 0 : index
    %0 = vector.load %arg1[%c0, %c0_0] : memref<8x128xf32, #tpu.memory_space<vmem>>, vector<8x128xf32>
    %c0_1 = arith.constant 0 : index
    %c0_2 = arith.constant 0 : index
    %1 = vector.load %arg2[%c0_1, %c0_2] : memref<128x128xf32, #tpu.memory_space<vmem>>, vector<128x128xf32>
    %c0_3 = arith.constant 0 : index
    %c0_4 = arith.constant 0 : index
    %2 = vector.load %arg3[%c0_3, %c0_4] : memref<1x128xf32, #tpu.memory_space<vmem>>, vector<1x128xf32>
    %cst = arith.constant dense<0.000000e+00> : vector<8x128xf32>
    %3 = tpu.matmul %0, %1, %cst {dimension_numbers = #tpu.dot_dimension_numbers<[1], [0], [0], [1], [0, 0, 1, 1], [], []>, precision = #tpu.contract_precision<fp32>} : vector<8x128xf32>, vector<128x128xf32>, vector<8x128xf32> -> vector<8x128xf32>
    %4 = vector.broadcast %2 : vector<1x128xf32> to vector<8x128xf32>
    %5 = arith.addf %3, %4 : vector<8x128xf32>
    %6 = math.tanh %5 : vector<8x128xf32>
    %c0_5 = arith.constant 0 : index
    %c0_6 = arith.constant 0 : index
    %7 = vector.load %arg4[%c0_5, %c0_6] : memref<128x128xf32, #tpu.memory_space<vmem>>, vector<128x128xf32>
    %c0_7 = arith.constant 0 : index
    %c0_8 = arith.constant 0 : index
    %8 = vector.load %arg5[%c0_7, %c0_8] : memref<1x128xf32, #tpu.memory_space<vmem>>, vector<1x128xf32>
    %cst_9 = arith.constant dense<0.000000e+00> : vector<8x128xf32>
    %9 = tpu.matmul %6, %7, %cst_9 {dimension_numbers = #tpu.dot_dimension_numbers<[1], [0], [0], [1], [0, 0, 1, 1], [], []>, precision = #tpu.contract_precision<fp32>} : vector<8x128xf32>, vector<128x128xf32>, vector<8x128xf32> -> vector<8x128xf32>
    %10 = vector.broadcast %8 : vector<1x128xf32> to vector<8x128xf32>
    %11 = arith.addf %9, %10 : vector<8x128xf32>
    %cst_10 = arith.constant 0.000000e+00 : f32
    %12 = vector.broadcast %cst_10 : f32 to vector<8x128xf32>
    %13 = arith.maximumf %11, %12 : vector<8x128xf32>
    %c0_11 = arith.constant 0 : index
    %c0_12 = arith.constant 0 : index
    %14 = vector.load %arg6[%c0_11, %c0_12] : memref<128x128xf32, #tpu.memory_space<vmem>>, vector<128x128xf32>
    %c0_13 = arith.constant 0 : index
    %c0_14 = arith.constant 0 : index
    %15 = vector.load %arg7[%c0_13, %c0_14] : memref<1x128xf32, #tpu.memory_space<vmem>>, vector<1x128xf32>
    %cst_15 = arith.constant dense<0.000000e+00> : vector<8x128xf32>
    %16 = tpu.matmul %13, %14, %cst_15 {dimension_numbers = #tpu.dot_dimension_numbers<[1], [0], [0], [1], [0, 0, 1, 1], [], []>, precision = #tpu.contract_precision<fp32>} : vector<8x128xf32>, vector<128x128xf32>, vector<8x128xf32> -> vector<8x128xf32>
    %17 = vector.broadcast %15 : vector<1x128xf32> to vector<8x128xf32>
    %18 = arith.addf %16, %17 : vector<8x128xf32>
    %c0_16 = arith.constant 0 : index
    %c0_17 = arith.constant 0 : index
    %19 = vector.load %arg8[%c0_16, %c0_17] : memref<8x128xf32, #tpu.memory_space<vmem>>, vector<8x128xf32>
    tpu.vector_store %arg8[%c0_16, %c0_17], %18 {strides = array<i32>} : memref<8x128xf32, #tpu.memory_space<vmem>>, vector<8x128xf32>,
    return
  }
  func.func @transform_0(%arg0: i32) -> (i32, i32) {
    %c0_i32 = arith.constant 0 : i32
    %c0_i32_0 = arith.constant 0 : i32
    return %arg0, %c0_i32 : i32, i32
  }
  func.func @transform_1(%arg0: i32) -> (i32, i32) {
    %c0_i32 = arith.constant 0 : i32
    %c0_i32_0 = arith.constant 0 : i32
    %c0_i32_1 = arith.constant 0 : i32
    return %c0_i32, %c0_i32_0 : i32, i32
  }
  func.func @transform_2(%arg0: i32) -> (i32, i32) {
    %c0_i32 = arith.constant 0 : i32
    %c0_i32_0 = arith.constant 0 : i32
    %c0_i32_1 = arith.constant 0 : i32
    return %c0_i32, %c0_i32_0 : i32, i32
  }
  func.func @transform_3(%arg0: i32) -> (i32, i32) {
    %c0_i32 = arith.constant 0 : i32
    %c0_i32_0 = arith.constant 0 : i32
    %c0_i32_1 = arith.constant 0 : i32
    return %c0_i32, %c0_i32_0 : i32, i32
  }
  func.func @transform_4(%arg0: i32) -> (i32, i32) {
    %c0_i32 = arith.constant 0 : i32
    %c0_i32_0 = arith.constant 0 : i32
    %c0_i32_1 = arith.constant 0 : i32
    return %c0_i32, %c0_i32_0 : i32, i32
  }
  func.func @transform_5(%arg0: i32) -> (i32, i32) {
    %c0_i32 = arith.constant 0 : i32
    %c0_i32_0 = arith.constant 0 : i32
    %c0_i32_1 = arith.constant 0 : i32
    return %c0_i32, %c0_i32_0 : i32, i32
  }
  func.func @transform_6(%arg0: i32) -> (i32, i32) {
    %c0_i32 = arith.constant 0 : i32
    %c0_i32_0 = arith.constant 0 : i32
    %c0_i32_1 = arith.constant 0 : i32
    return %c0_i32, %c0_i32_0 : i32, i32
  }
  func.func @transform_7(%arg0: i32) -> (i32, i32) {
    %c0_i32 = arith.constant 0 : i32
    %c0_i32_0 = arith.constant 0 : i32
    return %arg0, %c0_i32 : i32, i32
  }
}

</mosaic_0001>

<bundles_post_ra>
// kernel: tpu_custom_call.1
= control target key start
LH: loop header
LB: loop body
LE: loop exit
PB: predicated region body
PF: predicated region fallthrough
CT: control target
= control target key end

     0   :  { %12 = vsyncpa [#allocation3], 0  ;;  %s2086_s0 = inlined_call_operand.hbm [shape: f32[8,128], index: 0, kind: input, shape index: {}]   ;;  %s2087_s1 = inlined_call_operand.hbm [shape: f32[128,128], index: 1, kind: input, shape index: {}]   ;;  %s2088_s2 = inlined_call_operand.vmem [shape: f32[1,128], index: 2, kind: input, shape index: {}]   ;;  %s2089_s3 = inlined_call_operand.hbm [shape: f32[128,128], index: 3, kind: input, shape index: {}]   ;;  %s2090_s4 = inlined_call_operand.vmem [shape: f32[1,128], index: 4, kind: input, shape index: {}]   ;;  %s2091_s5 = inlined_call_operand.hbm [shape: f32[128,128], index: 5, kind: input, shape index: {}]   ;;  %s2092_s6 = inlined_call_operand.vmem [shape: f32[1,128], index: 6, kind: input, shape index: {}]   ;;  %s2093_s7 = inlined_call_operand.hbm [shape: f32[8,128], index: 7, kind: output, shape index: {}]  }
   0x1   :  { %13 = vsyncpa [#allocation6], 0 }
   0x2   :  { %14 = vsyncpa [#allocation9], 0  ;;  %s31_s26 = sshll.u32 %s2087_s1, 4  ;;  %s32_s26 = int_to_ptr.hbm [resolvable:$true] %s31_s26 }
   0x3   :  { %15 = vsyncpa [#allocation4], 0  ;;  %s1334_s27 = smov [#allocation5]   ;;  %s21_s8 = sshll.u32 %s2086_s0, 4  ;;  %s22_s8 = int_to_ptr.hbm [resolvable:$true] %s21_s8 }
   0x4   :  { %s33_s28 = sshll.u32 %s1334_s27, 4  ;;  %s1335_s9 = smov 128   ;;  %s34_s28 = int_to_ptr.vmem [resolvable:$true] %s33_s28 }
   0x5   :  { %s1336_s10 = smov 8   ;;  %s1337_s11 = smov [#allocation2]  }
   0x6   :  { %39 = dma.hbm_to_vmem [thread:$0]  %s32_s26, 2048, %s34_s28, [#allocation6], %s1335_s9, %s1335_s9, %s1336_s10  }
   0x7   :  { %s23_s12 = sshll.u32 %s1337_s11, 4  ;;  %s46_s15 = sshll.u32 %s2089_s3, 4  ;;  %s24_s12 = int_to_ptr.vmem [resolvable:$true] %s23_s12  ;;  %s47_s15 = int_to_ptr.hbm [resolvable:$true] %s46_s15 }
   0x8   :  { %26 = dma.hbm_to_vmem [thread:$0]  %s22_s8, 128, %s24_s12, [#allocation3]  }
   0x9   :  { %s61_s17 = sshll.u32 %s2091_s5, 4  ;;  %s1338_s18 = smov [#allocation7]   ;;  %s62_s17 = int_to_ptr.hbm [resolvable:$true] %s61_s17 }
   0xa   :  { %s48_s19 = sshll.u32 %s1338_s18, 4  ;;  %s1339_s0 = smov [#allocation8]   ;;  %s49_s19 = int_to_ptr.vmem [resolvable:$true] %s48_s19 }
   0xb   :  { %54 = dma.hbm_to_vmem [thread:$0]  %s47_s15, 2048, %s49_s19, [#allocation6], %s1335_s9, %s1335_s9, %s1336_s10  }
   0xc   :  { %s63_s20 = sshll.u32 %s1339_s0, 4  ;;  %s64_s20 = int_to_ptr.vmem [resolvable:$true] %s63_s20 }
   0xd   :  { %69 = dma.hbm_to_vmem [thread:$0]  %s62_s17, 2048, %s64_s20, [#allocation9], %s1335_s9, %s1335_s9, %s1336_s10  }
   0xe   :  { %1326 = dma.done.wait [#allocation3], 128  }
   0xf   :  { %1327 = vsyncadd [#allocation3], 4294967168 }
  0x10   :  { %1328 = dma.done.wait [#allocation6], 4096  }
  0x11   :  { %1329 = vsyncadd [#allocation6], 4294963200 }
  0x12   :  { %1330 = dma.done.wait [#allocation9], 2048  }
  0x13   :  { %1331 = vsyncadd [#allocation9], 4294965248  ;;  %v104_v0 = vld [vmem:[#allocation5 + $0x78] sm:$0xff]  ;;  %v103_v1 = vld [vmem:[#allocation5 + $0x70] sm:$0xff]  ;;  %s1340_s23 = smov [#allocation10]   ;;  %s1182_s27 = sshll.u32 %s2093_s7, 4  ;;  %s1183_s27 = int_to_ptr.hbm [resolvable:$true] %s1182_s27 }
  0x14   :  { %v102_v2 = vld [vmem:[#allocation5 + $0x68] sm:$0xff]  ;;  %v1393_v3 = vand.u32 4294901760, %v104_v0  ;;  %v1395_v4 = vand.u32 4294901760, %v103_v1  ;;  %v101_v6 = vld [vmem:[#allocation5 + $0x60] sm:$0xff]  ;;  %v100_v7 = vld [vmem:[#allocation5 + $0x58] sm:$0xff]  ;;  %s1180_s24 = sshll.u32 %s1340_s23, 4  ;;  %s1181_s24 = int_to_ptr.vmem [resolvable:$true] %s1180_s24 }
  0x15   :  { %v1397_v5 = vand.u32 4294901760, %v102_v2  ;;  %v99_v8 = vld [vmem:[#allocation5 + $0x50] sm:$0xff]  ;;  %v1399_v9 = vand.u32 4294901760, %v101_v6  ;;  %v1401_v10 = vand.u32 4294901760, %v100_v7  ;;  %v98_v12 = vld [vmem:[#allocation5 + $0x48] sm:$0xff]  ;;  %v97_v13 = vld [vmem:[#allocation5 + $0x40] sm:$0xff] }
  0x16   :  { %v1403_v11 = vand.u32 4294901760, %v99_v8  ;;  %110 = vmatpush.msra.mxu0 %v1393_v3  ;;  %v1407_v14 = vsub.f32 %v104_v0, %v1393_v3  ;;  %v1410_v15 = vsub.f32 %v103_v1, %v1395_v4  ;;  %v1415_v17 = vand.u32 4294901760, %v98_v12  ;;  %306 = vmatpush.msra.mxu3 %v1393_v3  ;;  %v96_v21 = vld [vmem:[#allocation5 + $0x38] sm:$0xff]  ;;  %v95_v34 = vld [vmem:[#allocation5 + $0x30] sm:$0xff]  ;;  %v94_v35 = vld [vmem:[#allocation5 + $0x28] sm:$0xff] }
  0x17   :  { %v1413_v16 = vsub.f32 %v102_v2, %v1397_v5  ;;  %v1419_v18 = vsub.f32 %v101_v6, %v1399_v9  ;;  %v1422_v19 = vsub.f32 %v100_v7, %v1401_v10  ;;  %v1424_v20 = vand.u32 4294901760, %v97_v13  ;;  %v93_v42 = vld [vmem:[#allocation5 + $0x20] sm:$0xff]  ;;  %v92_v47 = vld [vmem:[#allocation5 + $0x18] sm:$0xff]  ;;  %v91_v53 = vld [vmem:[#allocation5 + $0x10] sm:$0xff] }
  0x18   :  { %112 = vmatpush.msra.mxu0 %v1395_v4  ;;  %v152_v22 = vand.u32 4294901760, %v1407_v14  ;;  %v158_v23 = vand.u32 4294901760, %v1410_v15  ;;  %v1431_v25 = vsub.f32 %v99_v8, %v1403_v11  ;;  %253 = vmatpush.msra.mxu2 %v1407_v14  ;;  %v1437_v28 = vsub.f32 %v98_v12, %v1415_v17  ;;  %v90_v61 = vld [vmem:[#allocation5 + $0x8] sm:$0xff]  ;;  %v89_v2 = vld [vmem:[#allocation5] sm:$0xff] }
  0x19   :  { %v164_v24 = vand.u32 4294901760, %v1413_v16  ;;  %v170_v26 = vand.u32 4294901760, %v1419_v18  ;;  %v176_v27 = vand.u32 4294901760, %v1422_v19  ;;  %308 = vmatpush.msra.mxu3 %v1395_v4  ;;  %v1450_v32 = vand.u32 4294901760, %v96_v21 }
  0x1a   :  { %v153_v29 = vsub.f32 %v1407_v14, %v152_v22  ;;  %114 = vmatpush.msra.mxu0 %v1397_v5  ;;  %v159_v30 = vsub.f32 %v1410_v15, %v158_v23  ;;  %256 = vmatpush.msra.mxu2 %v1410_v15  ;;  %v1454_v33 = vsub.f32 %v97_v13, %v1424_v20  ;;  %v182_v39 = vand.u32 4294901760, %v1431_v25  ;;  %v466_v14 = vld [vmem:[#allocation7 + $0x78] sm:$0xff] }
  0x1b   :  { %v165_v31 = vsub.f32 %v1413_v16, %v164_v24  ;;  %310 = vmatpush.msra.mxu3 %v1397_v5  ;;  %v171_v38 = vsub.f32 %v1419_v18, %v170_v26  ;;  %v177_v40 = vsub.f32 %v1422_v19, %v176_v27  ;;  %v188_v41 = vand.u32 4294901760, %v1437_v28 }
  0x1c   :  { %v154_v36 = vand.u32 4294901760, %v153_v29  ;;  %v160_v37 = vand.u32 4294901760, %v159_v30  ;;  %116 = vmatpush.msra.mxu0 %v1399_v9  ;;  %259 = vmatpush.msra.mxu2 %v1413_v16  ;;  %v1469_v44 = vand.u32 4294901760, %v95_v34  ;;  %v1472_v45 = vsub.f32 %v96_v21, %v1450_v32  ;;  %v88_v29 = vld [vmem:[#allocation2] sm:$0xff] }
  0x1d   :  { %312 = vmatpush.msra.mxu3 %v1399_v9  ;;  %v166_v43 = vand.u32 4294901760, %v165_v31  ;;  %v1474_v46 = vand.u32 4294901760, %v94_v35  ;;  %v194_v48 = vand.u32 4294901760, %v1454_v33  ;;  %v172_v49 = vand.u32 4294901760, %v171_v38 }
  0x1e   :  { %155 = vmatpush.msra.mxu1 %v154_v36  ;;  %118 = vmatpush.msra.mxu0 %v1401_v10  ;;  %v183_v50 = vsub.f32 %v1431_v25, %v182_v39  ;;  %v1484_v51 = vsub.f32 %v95_v34, %v1469_v44  ;;  %v1486_v52 = vand.u32 4294901760, %v93_v42  ;;  %v1488_v54 = vand.u32 4294901760, %v92_v47 }
  0x1f   :  { %262 = vmatpush.msra.mxu2 %v1419_v18  ;;  %314 = vmatpush.msra.mxu3 %v1401_v10  ;;  %v178_v55 = vand.u32 4294901760, %v177_v40  ;;  %v189_v56 = vsub.f32 %v1437_v28, %v188_v41  ;;  %v200_v57 = vand.u32 4294901760, %v1472_v45  ;;  %v1498_v58 = vsub.f32 %v94_v35, %v1474_v46 }
  0x20   :  { %161 = vmatpush.msra.mxu1 %v160_v37  ;;  %120 = vmatpush.msra.mxu0 %v1403_v11  ;;  %v195_v59 = vsub.f32 %v1454_v33, %v194_v48  ;;  %v1503_v60 = vand.u32 4294901760, %v91_v53  ;;  %v184_v62 = vand.u32 4294901760, %v183_v50  ;;  %v206_v63 = vand.u32 4294901760, %v1484_v51 }
  0x21   :  { %265 = vmatpush.msra.mxu2 %v1422_v19  ;;  %316 = vmatpush.msra.mxu3 %v1403_v11  ;;  %v1510_v0 = vsub.f32 %v93_v42, %v1486_v52  ;;  %v1513_v1 = vsub.f32 %v92_v47, %v1488_v54  ;;  %v190_v6 = vand.u32 4294901760, %v189_v56  ;;  %v201_v7 = vsub.f32 %v1472_v45, %v200_v57  ;;  %v459_v19 = vld [vmem:[#allocation7 + $0x40] sm:$0xff] }
  0x22   :  { %167 = vmatpush.msra.mxu1 %v166_v43  ;;  %122 = vmatpush.msra.mxu0 %v1415_v17  ;;  %v212_v8 = vand.u32 4294901760, %v1498_v58  ;;  %v1522_v12 = vand.u32 4294901760, %v90_v61  ;;  %v196_v13 = vand.u32 4294901760, %v195_v59  ;;  %v1525_v21 = vsub.f32 %v91_v53, %v1503_v60 }
  0x23   :  { %268 = vmatpush.msra.mxu2 %v1431_v25  ;;  %318 = vmatpush.msra.mxu3 %v1415_v17  ;;  %v207_v30 = vsub.f32 %v1484_v51, %v206_v63  ;;  %v218_v31 = vand.u32 4294901760, %v1510_v0  ;;  %v1534_v34 = vand.u32 4294901760, %v89_v2  ;;  %v1536_v35 = vand.u32 4294901760, %v88_v29 }
  0x24   :  { %173 = vmatpush.msra.mxu1 %v172_v49  ;;  %124 = vmatpush.msra.mxu0 %v1424_v20  ;;  %v224_v36 = vand.u32 4294901760, %v1513_v1  ;;  %v202_v37 = vand.u32 4294901760, %v201_v7  ;;  %v213_v38 = vsub.f32 %v1498_v58, %v212_v8  ;;  %v1546_v40 = vsub.f32 %v90_v61, %v1522_v12 }
  0x25   :  { %271 = vmatpush.msra.mxu2 %v1437_v28  ;;  %320 = vmatpush.msra.mxu3 %v1424_v20  ;;  %v142_v42 = vsub.f32 %v88_v29, %v1536_v35  ;;  %v208_v43 = vand.u32 4294901760, %v207_v30  ;;  %v219_v47 = vsub.f32 %v1510_v0, %v218_v31  ;;  %v230_v49 = vand.u32 4294901760, %v1525_v21 }
  0x26   :  { %179 = vmatpush.msra.mxu1 %v178_v55  ;;  %126 = vmatpush.msra.mxu0 %v1450_v32  ;;  %v1557_v50 = vsub.f32 %v89_v2, %v1534_v34  ;;  %v214_v53 = vand.u32 4294901760, %v213_v38  ;;  %v225_v55 = vsub.f32 %v1513_v1, %v224_v36  ;;  %v236_v56 = vand.u32 4294901760, %v1546_v40 }
  0x27   :  { %274 = vmatpush.msra.mxu2 %v1454_v33  ;;  %322 = vmatpush.msra.mxu3 %v1450_v32  ;;  %v143_v59 = vand.u32 4294901760, %v142_v42  ;;  %v220_v61 = vand.u32 4294901760, %v219_v47  ;;  %v464_v47 = vld [vmem:[#allocation7 + $0x68] sm:$0xff]  ;;  %v1599_v15 = vand.u32 4294901760, %v466_v14  ;;  %v458_v33 = vld [vmem:[#allocation7 + $0x38] sm:$0xff] }
  0x28   :  { %185 = vmatpush.msra.mxu1 %v184_v62  ;;  %128 = vmatpush.msra.mxu0 %v1469_v44  ;;  %v231_v62 = vsub.f32 %v1525_v21, %v230_v49  ;;  %v242_v2 = vand.u32 4294901760, %v1557_v50  ;;  %v237_v7 = vsub.f32 %v1546_v40, %v236_v56  ;;  %v1603_v16 = vand.u32 4294901760, %v464_v47 }
  0x29   :  { %277 = vmatpush.msra.mxu2 %v1472_v45  ;;  %324 = vmatpush.msra.mxu3 %v1469_v44  ;;  %v1678_v45 = vand.u32 4294901760, %v458_v33 }
  0x2a   :  { %191 = vmatpush.msra.mxu1 %v190_v6  ;;  %130 = vmatpush.msra.mxu0 %v1474_v46  ;;  %v226_v6 = vand.u32 4294901760, %v225_v55  ;;  %v232_v29 = vand.u32 4294901760, %v231_v62  ;;  %v243_v30 = vsub.f32 %v1557_v50, %v242_v2 }
  0x2b   :  { %280 = vmatpush.msra.mxu2 %v1484_v51  ;;  %326 = vmatpush.msra.mxu3 %v1474_v46  ;;  %v1693_v51 = vsub.f32 %v458_v33, %v1678_v45 }
  0x2c   :  { %197 = vmatpush.msra.mxu1 %v196_v13  ;;  %132 = vmatpush.msra.mxu0 %v1486_v52  ;;  %v144_v13 = vsub.f32 %v142_v42, %v143_v59 }
  0x2d   :  { %283 = vmatpush.msra.mxu2 %v1498_v58  ;;  %328 = vmatpush.msra.mxu3 %v1486_v52 }
  0x2e   :  { %203 = vmatpush.msra.mxu1 %v202_v37  ;;  %134 = vmatpush.msra.mxu0 %v1488_v54  ;;  %v238_v37 = vand.u32 4294901760, %v237_v7  ;;  %v145_v38 = vand.u32 4294901760, %v144_v13  ;;  %v1639_v13 = vand.u32 4294901760, %v459_v19 }
  0x2f   :  { %286 = vmatpush.msra.mxu2 %v1510_v0  ;;  %330 = vmatpush.msra.mxu3 %v1488_v54  ;;  %v452_v0 = vld [vmem:[#allocation7 + $0x8] sm:$0xff] }
  0x30   :  { %209 = vmatpush.msra.mxu1 %v208_v43  ;;  %136 = vmatpush.msra.mxu0 %v1503_v60  ;;  %v244_v43 = vand.u32 4294901760, %v243_v30 }
  0x31   :  { %289 = vmatpush.msra.mxu2 %v1513_v1  ;;  %332 = vmatpush.msra.mxu3 %v1503_v60  ;;  %v451_v1 = vld [vmem:[#allocation7] sm:$0xff] }
  0x32   :  { %215 = vmatpush.msra.mxu1 %v214_v53  ;;  %138 = vmatpush.msra.mxu0 %v1522_v12  ;;  %v461_v53 = vld [vmem:[#allocation7 + $0x50] sm:$0xff] }
  0x33   :  { %292 = vmatpush.msra.mxu2 %v1525_v21  ;;  %334 = vmatpush.msra.mxu3 %v1522_v12  ;;  %v1610_v55 = vand.u32 4294901760, %v461_v53 }
  0x34   :  { %221 = vmatpush.msra.mxu1 %v220_v61  ;;  %140 = vmatpush.msra.mxu0 %v1534_v34  ;;  %v1622_v61 = vsub.f32 %v464_v47, %v1603_v16 }
  0x35   :  { %295 = vmatpush.msra.mxu2 %v1546_v40  ;;  %336 = vmatpush.msra.mxu3 %v1534_v34  ;;  %v1644_v30 = vsub.f32 %v461_v53, %v1610_v55 }
  0x36   :  { %347 = vmatpush.msrb.mxu0 %v152_v22  ;;  %227 = vmatpush.msra.mxu1 %v226_v6  ;;  %v465_v22 = vld [vmem:[#allocation7 + $0x70] sm:$0xff]  ;;  %v526_v7 = vand.u32 4294901760, %v1622_v61 }
  0x37   :  { %298 = vmatpush.msra.mxu2 %v1557_v50  ;;  %340 = vmatmul.f32.vlgmr.msra.gmra.mxu3 %v143_v59 }
  0x38   :  { %351 = vmatpush.msrb.mxu0 %v158_v23  ;;  %233 = vmatpush.msra.mxu1 %v232_v29  ;;  %v1601_v23 = vand.u32 4294901760, %v465_v22 }
  0x39   :  { %301 = vmatmul.f32.vlgmr.msra.gmra.mxu2 %v142_v42  ;;  %146 = vmatmul.f32.vlgmr.msra.gmra.mxu0 %v145_v38  ;;  %v462_v42 = vld [vmem:[#allocation7 + $0x58] sm:$0xff] }
  0x3a   :  { %355 = vmatpush.msrb.mxu0 %v164_v24  ;;  %239 = vmatpush.msra.mxu1 %v238_v37  ;;  %v463_v24 = vld [vmem:[#allocation7 + $0x60] sm:$0xff]  ;;  %v1619_v59 = vsub.f32 %v465_v22, %v1601_v23  ;;  %v527_v37 = vsub.f32 %v1622_v61, %v526_v7 }
  0x3b   :  { %v1606_v18 = vand.u32 4294901760, %v463_v24  ;;  %472 = vmatpush.msrb.mxu2 %v1599_v15 }
  0x3c   :  { %359 = vmatpush.msrb.mxu0 %v170_v26  ;;  %245 = vmatpush.msra.mxu1 %v244_v43  ;;  %v1608_v26 = vand.u32 4294901760, %v462_v42  ;;  %v1667_v43 = vsub.f32 %v459_v19, %v1639_v13  ;;  %v528_v53 = vand.u32 4294901760, %v527_v37 }
  0x3d   :  { %247 = vmatmul.f32.vlgmr.msra.gmra.mxu1 %v1536_v35  ;;  %v1627_v6 = vsub.f32 %v463_v24, %v1606_v18  ;;  %474 = vmatpush.msrb.mxu2 %v1601_v23  ;;  %v544_v24 = vand.u32 4294901760, %v1644_v30 }
  0x3e   :  { %414 = vmatpush.msrb.mxu1 %v1393_v3  ;;  %363 = vmatpush.msrb.mxu0 %v176_v27  ;;  %v460_v3 = vld [vmem:[#allocation7 + $0x48] sm:$0xff]  ;;  %v1616_v27 = vsub.f32 %v466_v14, %v1599_v15 }
  0x3f   :  { %v1624_v62 = vand.u32 4294901760, %v460_v3  ;;  %v532_v29 = vand.u32 4294901760, %v1627_v6  ;;  %476 = vmatpush.msrb.mxu2 %v1603_v16  ;;  %v456_v14 = vld [vmem:[#allocation7 + $0x28] sm:$0xff] }
  0x40   :  { %416 = vmatpush.msrb.mxu1 %v1395_v4  ;;  %367 = vmatpush.msrb.mxu0 %v182_v39  ;;  %v1631_v4 = vsub.f32 %v462_v42, %v1608_v26  ;;  %v514_v25 = vand.u32 4294901760, %v1616_v27  ;;  %v520_v39 = vand.u32 4294901760, %v1619_v59  ;;  %v455_v42 = vld [vmem:[#allocation7 + $0x20] sm:$0xff]  ;;  %v1686_v19 = vand.u32 4294901760, %v456_v14 }
  0x41   :  { %v533_v47 = vsub.f32 %v1627_v6, %v532_v29  ;;  %478 = vmatpush.msrb.mxu2 %v1606_v18 }
  0x42   :  { %418 = vmatpush.msrb.mxu1 %v1397_v5  ;;  %371 = vmatpush.msrb.mxu0 %v188_v41  ;;  %v515_v5 = vsub.f32 %v1616_v27, %v514_v25  ;;  %v521_v28 = vsub.f32 %v1619_v59, %v520_v39  ;;  %v1656_v41 = vsub.f32 %v460_v3, %v1624_v62 }
  0x43   :  { %480 = vmatpush.msrb.mxu2 %v1608_v26 }
  0x44   :  { %420 = vmatpush.msrb.mxu1 %v1399_v9  ;;  %375 = vmatpush.msrb.mxu0 %v194_v48  ;;  %v538_v9 = vand.u32 4294901760, %v1631_v4  ;;  %v457_v48 = vld [vmem:[#allocation7 + $0x30] sm:$0xff]  ;;  %v516_v38 = vand.u32 4294901760, %v515_v5  ;;  %v522_v22 = vand.u32 4294901760, %v521_v28  ;;  %v534_v5 = vand.u32 4294901760, %v533_v47 }
  0x45   :  { %v545_v28 = vsub.f32 %v1644_v30, %v544_v24  ;;  %482 = vmatpush.msrb.mxu2 %v1610_v55 }
  0x46   :  { %422 = vmatpush.msrb.mxu1 %v1401_v10  ;;  %379 = vmatpush.msrb.mxu0 %v200_v57  ;;  %v550_v10 = vand.u32 4294901760, %v1656_v41  ;;  %v1680_v57 = vand.u32 4294901760, %v457_v48  ;;  %v539_v3 = vsub.f32 %v1631_v4, %v538_v9 }
  0x47   :  { %517 = vmatpush.msrb.mxu3 %v516_v38  ;;  %v562_v38 = vand.u32 4294901760, %v1693_v51  ;;  %484 = vmatpush.msrb.mxu2 %v1624_v62 }
  0x48   :  { %424 = vmatpush.msrb.mxu1 %v1403_v11  ;;  %383 = vmatpush.msrb.mxu0 %v206_v63  ;;  %v556_v11 = vand.u32 4294901760, %v1667_v43  ;;  %v454_v63 = vld [vmem:[#allocation7 + $0x18] sm:$0xff]  ;;  %v1700_v37 = vsub.f32 %v457_v48, %v1680_v57  ;;  %v551_v58 = vsub.f32 %v1656_v41, %v550_v10  ;;  %v540_v33 = vand.u32 4294901760, %v539_v3 }
  0x49   :  { %523 = vmatpush.msrb.mxu3 %v522_v22  ;;  %v1713_v48 = vsub.f32 %v456_v14, %v1686_v19  ;;  %v1715_v22 = vand.u32 4294901760, %v454_v63  ;;  %486 = vmatpush.msrb.mxu2 %v1639_v13 }
  0x4a   :  { %426 = vmatpush.msrb.mxu1 %v1415_v17  ;;  %387 = vmatpush.msrb.mxu0 %v212_v8  ;;  %v1702_v17 = vand.u32 4294901760, %v455_v42  ;;  %v453_v8 = vld [vmem:[#allocation7 + $0x10] sm:$0xff]  ;;  %v568_v47 = vand.u32 4294901760, %v1700_v37 }
  0x4b   :  { %529 = vmatpush.msrb.mxu3 %v528_v53  ;;  %v1728_v53 = vand.u32 4294901760, %v453_v8  ;;  %v574_v3 = vand.u32 4294901760, %v1713_v48  ;;  %488 = vmatpush.msrb.mxu2 %v1678_v45 }
  0x4c   :  { %428 = vmatpush.msrb.mxu1 %v1424_v20  ;;  %391 = vmatpush.msrb.mxu0 %v218_v31  ;;  %v557_v20 = vsub.f32 %v1667_v43, %v556_v11  ;;  %v546_v31 = vand.u32 4294901760, %v545_v28  ;;  %v1726_v14 = vsub.f32 %v455_v42, %v1702_v17  ;;  %v1739_v42 = vsub.f32 %v454_v63, %v1715_v22 }
  0x4d   :  { %535 = vmatpush.msrb.mxu3 %v534_v5  ;;  %v1741_v5 = vand.u32 4294901760, %v452_v0  ;;  %v569_v21 = vsub.f32 %v1700_v37, %v568_v47  ;;  %490 = vmatpush.msrb.mxu2 %v1680_v57  ;;  %v1752_v63 = vsub.f32 %v453_v8, %v1728_v53  ;;  %v1754_v28 = vand.u32 4294901760, %v451_v1 }
  0x4e   :  { %430 = vmatpush.msrb.mxu1 %v1450_v32  ;;  %395 = vmatpush.msrb.mxu0 %v224_v36  ;;  %v552_v32 = vand.u32 4294901760, %v551_v58  ;;  %v563_v36 = vsub.f32 %v1693_v51, %v562_v38  ;;  %v575_v40 = vsub.f32 %v1713_v48, %v574_v3 }
  0x4f   :  { %541 = vmatpush.msrb.mxu3 %v540_v33  ;;  %v1765_v58 = vsub.f32 %v452_v0, %v1741_v5  ;;  %492 = vmatpush.msrb.mxu2 %v1686_v19  ;;  %v1775_v8 = vsub.f32 %v451_v1, %v1754_v28 }
  0x50   :  { %432 = vmatpush.msrb.mxu1 %v1469_v44  ;;  %399 = vmatpush.msrb.mxu0 %v230_v49  ;;  %v558_v44 = vand.u32 4294901760, %v557_v20  ;;  %v580_v49 = vand.u32 4294901760, %v1726_v14 }
  0x51   :  { %547 = vmatpush.msrb.mxu3 %v546_v31  ;;  %v598_v20 = vand.u32 4294901760, %v1765_v58  ;;  %494 = vmatpush.msrb.mxu2 %v1702_v17  ;;  %v604_v31 = vand.u32 4294901760, %v1775_v8 }
  0x52   :  { %434 = vmatpush.msrb.mxu1 %v1474_v46  ;;  %403 = vmatpush.msrb.mxu0 %v236_v56  ;;  %v564_v46 = vand.u32 4294901760, %v563_v36  ;;  %v586_v56 = vand.u32 4294901760, %v1739_v42  ;;  %v581_v50 = vsub.f32 %v1726_v14, %v580_v49 }
  0x53   :  { %553 = vmatpush.msrb.mxu3 %v552_v32  ;;  %496 = vmatpush.msrb.mxu2 %v1715_v22  ;;  %v599_v32 = vsub.f32 %v1765_v58, %v598_v20 }
  0x54   :  { %436 = vmatpush.msrb.mxu1 %v1486_v52  ;;  %407 = vmatpush.msrb.mxu0 %v242_v2  ;;  %v570_v52 = vand.u32 4294901760, %v569_v21  ;;  %v592_v2 = vand.u32 4294901760, %v1752_v63  ;;  %v587_v33 = vsub.f32 %v1739_v42, %v586_v56  ;;  %v582_v0 = vand.u32 4294901760, %v581_v50 }
  0x55   :  { %409 = vmatmul.f32.vlgmr.msrb.gmra.mxu0 %v1536_v35  ;;  %559 = vmatpush.msrb.mxu3 %v558_v44 }
  0x56   :  { %438 = vmatpush.msrb.mxu1 %v1488_v54  ;;  %615 = vmatpush.msra.mxu0 %v1616_v27  ;;  %v576_v54 = vand.u32 4294901760, %v575_v40 }
  0x57   :  { %565 = vmatpush.msrb.mxu3 %v564_v46  ;;  %498 = vmatpush.msrb.mxu2 %v1728_v53 }
  0x58   :  { %440 = vmatpush.msrb.mxu1 %v1503_v60  ;;  %618 = vmatpush.msra.mxu0 %v1619_v59  ;;  %v593_v60 = vsub.f32 %v1752_v63, %v592_v2 }
  0x59   :  { %571 = vmatpush.msrb.mxu3 %v570_v52  ;;  %500 = vmatpush.msrb.mxu2 %v1741_v5  ;;  %v818_v52 = vld [vmem:[#allocation8 + $0x28] sm:$0xff] }
  0x5a   :  { %442 = vmatpush.msrb.mxu1 %v1522_v12  ;;  %621 = vmatpush.msra.mxu0 %v1622_v61  ;;  %v588_v12 = vand.u32 4294901760, %v587_v33  ;;  %v594_v1 = vand.u32 4294901760, %v593_v60 }
  0x5b   :  { %577 = vmatpush.msrb.mxu3 %v576_v54  ;;  %502 = vmatpush.msrb.mxu2 %v1754_v28 }
  0x5c   :  { %444 = vmatpush.msrb.mxu1 %v1534_v34  ;;  %624 = vmatpush.msra.mxu0 %v1627_v6  ;;  %v605_v34 = vsub.f32 %v1775_v8, %v604_v31  ;;  %v828_v6 = vld [vmem:[#allocation8 + $0x78] sm:$0xff] }
  0x5d   :  { %446 = vmatmul.f32.vlgmr.msrb.gmra.mxu1 %v1536_v35  ;;  %583 = vmatpush.msrb.mxu3 %v582_v0  ;;  %v600_v35 = vand.u32 4294901760, %v599_v32 }
  0x5e   :  { %668 = vmatpush.msra.mxu1 %v1599_v15  ;;  %627 = vmatpush.msra.mxu0 %v1631_v4  ;;  %v606_v36 = vand.u32 4294901760, %v605_v34  ;;  %v827_v4 = vld [vmem:[#allocation8 + $0x70] sm:$0xff]  ;;  %v816_v34 = vld [vmem:[#allocation8 + $0x18] sm:$0xff] }
  0x5f   :  { %589 = vmatpush.msrb.mxu3 %v588_v12  ;;  %709 = vmatpush.msra.mxu2 %v514_v25  ;;  %v826_v25 = vld [vmem:[#allocation8 + $0x68] sm:$0xff]  ;;  %v1953_v12 = vand.u32 4294901760, %v818_v52 }
  0x60   :  { %670 = vmatpush.msra.mxu1 %v1601_v23  ;;  %630 = vmatpush.msra.mxu0 %v1644_v30  ;;  %v825_v30 = vld [vmem:[#allocation8 + $0x60] sm:$0xff] }
  0x61   :  { %595 = vmatpush.msrb.mxu3 %v594_v1  ;;  %713 = vmatpush.msra.mxu2 %v520_v39 }
  0x62   :  { %672 = vmatpush.msra.mxu1 %v1603_v16  ;;  %633 = vmatpush.msra.mxu0 %v1656_v41  ;;  %v824_v41 = vld [vmem:[#allocation8 + $0x58] sm:$0xff] }
  0x63   :  { %601 = vmatpush.msrb.mxu3 %v600_v35  ;;  %717 = vmatpush.msra.mxu2 %v526_v7  ;;  %v1882_v7 = vand.u32 4294901760, %v828_v6 }
  0x64   :  { %674 = vmatpush.msra.mxu1 %v1606_v18  ;;  %636 = vmatpush.msra.mxu0 %v1667_v43  ;;  %v1888_v43 = vand.u32 4294901760, %v825_v30 }
  0x65   :  { %607 = vmatpush.msrb.mxu3 %v606_v36  ;;  %721 = vmatpush.msra.mxu2 %v532_v29  ;;  %v1886_v29 = vand.u32 4294901760, %v826_v25 }
  0x66   :  { %676 = vmatpush.msra.mxu1 %v1608_v26  ;;  %639 = vmatpush.msra.mxu0 %v1693_v51 }
  0x67   :  { %776 = vmatpush.msra.mxu3 %v1599_v15  ;;  %725 = vmatpush.msra.mxu2 %v538_v9  ;;  %v1201_v15 = vld [vmem:[%s2088_s2] ss:$0 sm:$0xff]  ;;  %v823_v9 = vld [vmem:[#allocation8 + $0x50] sm:$0xff]  ;;  %v1901_v51 = vsub.f32 %v826_v25, %v1886_v29 }
  0x68   :  { %678 = vmatpush.msra.mxu1 %v1610_v55  ;;  %642 = vmatpush.msra.mxu0 %v1700_v37 }
  0x69   :  { %778 = vmatpush.msra.mxu3 %v1601_v23  ;;  %729 = vmatpush.msra.mxu2 %v544_v24  ;;  %v1890_v24 = vand.u32 4294901760, %v824_v41 }
  0x6a   :  { %680 = vmatpush.msra.mxu1 %v1624_v62  ;;  %645 = vmatpush.msra.mxu0 %v1713_v48 }
  0x6b   :  { %780 = vmatpush.msra.mxu3 %v1603_v16  ;;  %733 = vmatpush.msra.mxu2 %v550_v10  ;;  %v1892_v10 = vand.u32 4294901760, %v823_v9  ;;  %v1910_v48 = vsub.f32 %v824_v41, %v1890_v24 }
  0x6c   :  { %682 = vmatpush.msra.mxu1 %v1639_v13  ;;  %648 = vmatpush.msra.mxu0 %v1726_v14 }
  0x6d   :  { %782 = vmatpush.msra.mxu3 %v1606_v18  ;;  %737 = vmatpush.msra.mxu2 %v556_v11  ;;  %v900_v44 = vand.u32 4294901760, %v1910_v48 }
  0x6e   :  { %684 = vmatpush.msra.mxu1 %v1678_v45  ;;  %651 = vmatpush.msra.mxu0 %v1739_v42  ;;  %v888_v42 = vand.u32 4294901760, %v1901_v51 }
  0x6f   :  { %784 = vmatpush.msra.mxu3 %v1608_v26  ;;  %741 = vmatpush.msra.mxu2 %v562_v38  ;;  %v1907_v38 = vsub.f32 %v825_v30, %v1888_v43  ;;  %v901_v54 = vsub.f32 %v1910_v48, %v900_v44 }
  0x70   :  { %686 = vmatpush.msra.mxu1 %v1680_v57  ;;  %654 = vmatpush.msra.mxu0 %v1752_v63 }
  0x71   :  { %786 = vmatpush.msra.mxu3 %v1610_v55  ;;  %745 = vmatpush.msra.mxu2 %v568_v47 }
  0x72   :  { %688 = vmatpush.msra.mxu1 %v1686_v19  ;;  %657 = vmatpush.msra.mxu0 %v1765_v58  ;;  %v819_v58 = vld [vmem:[#allocation8 + $0x30] sm:$0xff] }
  0x73   :  { %788 = vmatpush.msra.mxu3 %v1624_v62  ;;  %749 = vmatpush.msra.mxu2 %v574_v3 }
  0x74   :  { %690 = vmatpush.msra.mxu1 %v1702_v17  ;;  %660 = vmatpush.msra.mxu0 %v1775_v8 }
  0x75   :  { %790 = vmatpush.msra.mxu3 %v1639_v13  ;;  %753 = vmatpush.msra.mxu2 %v580_v49  ;;  %v1884_v13 = vand.u32 4294901760, %v827_v4 }
  0x76   :  { %692 = vmatpush.msra.mxu1 %v1715_v22  ;;  %834 = vmatpush.msrb.mxu0 %v1882_v7 }
  0x77   :  { %792 = vmatpush.msra.mxu3 %v1678_v45  ;;  %757 = vmatpush.msra.mxu2 %v586_v56  ;;  %v822_v45 = vld [vmem:[#allocation8 + $0x48] sm:$0xff]  ;;  %v1898_v11 = vsub.f32 %v827_v4, %v1884_v13  ;;  %v820_v56 = vld [vmem:[#allocation8 + $0x38] sm:$0xff] }
  0x78   :  { %694 = vmatpush.msra.mxu1 %v1728_v53  ;;  %v1904_v37 = vand.u32 4294901760, %v822_v45  ;;  %836 = vmatpush.msrb.mxu0 %v1884_v13  ;;  %v1949_v60 = vand.u32 4294901760, %v820_v56 }
  0x79   :  { %794 = vmatpush.msra.mxu3 %v1680_v57  ;;  %761 = vmatpush.msra.mxu2 %v592_v2  ;;  %v821_v57 = vld [vmem:[#allocation8 + $0x40] sm:$0xff]  ;;  %v882_v3 = vand.u32 4294901760, %v1898_v11 }
  0x7a   :  { %696 = vmatpush.msra.mxu1 %v1741_v5  ;;  %v1915_v47 = vand.u32 4294901760, %v821_v57  ;;  %v1924_v21 = vsub.f32 %v822_v45, %v1904_v37  ;;  %838 = vmatpush.msrb.mxu0 %v1886_v29 }
  0x7b   :  { %796 = vmatpush.msra.mxu3 %v1686_v19  ;;  %765 = vmatpush.msra.mxu2 %v598_v20  ;;  %v1895_v19 = vsub.f32 %v828_v6, %v1882_v7  ;;  %v883_v63 = vsub.f32 %v1898_v11, %v882_v3  ;;  %v817_v20 = vld [vmem:[#allocation8 + $0x20] sm:$0xff] }
  0x7c   :  { %698 = vmatpush.msra.mxu1 %v1754_v28  ;;  %840 = vmatpush.msrb.mxu0 %v1888_v43  ;;  %v1942_v8 = vsub.f32 %v821_v57, %v1915_v47  ;;  %v912_v33 = vand.u32 4294901760, %v1924_v21 }
  0x7d   :  { %798 = vmatpush.msra.mxu3 %v1702_v17  ;;  %769 = vmatpush.msra.mxu2 %v604_v31  ;;  %v884_v2 = vand.u32 4294901760, %v883_v63  ;;  %v1951_v31 = vand.u32 4294901760, %v819_v58 }
  0x7e   :  { %842 = vmatpush.msrb.mxu0 %v1890_v24  ;;  %v918_v36 = vand.u32 4294901760, %v1942_v8 }
  0x7f   :  { %800 = vmatpush.msra.mxu3 %v1715_v22  ;;  %v1913_v22 = vsub.f32 %v823_v9, %v1892_v10 }
  0x80   :  { %844 = vmatpush.msrb.mxu0 %v1892_v10  ;;  %v919_v4 = vsub.f32 %v1942_v8, %v918_v36 }
  0x81   :  { %802 = vmatpush.msra.mxu3 %v1728_v53  ;;  %v876_v53 = vand.u32 4294901760, %v1895_v19  ;;  %v906_v40 = vand.u32 4294901760, %v1913_v22 }
  0x82   :  { %846 = vmatpush.msrb.mxu0 %v1904_v37 }
  0x83   :  { %804 = vmatpush.msra.mxu3 %v1741_v5  ;;  %v894_v5 = vand.u32 4294901760, %v1907_v38  ;;  %v877_v49 = vsub.f32 %v1895_v19, %v876_v53  ;;  %v907_v1 = vsub.f32 %v1913_v22, %v906_v40 }
  0x84   :  { %848 = vmatpush.msrb.mxu0 %v1915_v47 }
  0x85   :  { %806 = vmatpush.msra.mxu3 %v1754_v28  ;;  %v889_v28 = vsub.f32 %v1901_v51, %v888_v42  ;;  %v895_v46 = vsub.f32 %v1907_v38, %v894_v5  ;;  %v878_v50 = vand.u32 4294901760, %v877_v49  ;;  %v908_v6 = vand.u32 4294901760, %v907_v1 }
  0x86   :  { %850 = vmatpush.msrb.mxu0 %v1949_v60 }
  0x87   :  { %879 = vmatpush.msrb.mxu1 %v878_v50  ;;  %v890_v0 = vand.u32 4294901760, %v889_v28  ;;  %v896_v32 = vand.u32 4294901760, %v895_v46 }
  0x88   :  { %852 = vmatpush.msrb.mxu0 %v1951_v31 }
  0x89   :  { %885 = vmatpush.msrb.mxu1 %v884_v2 }
  0x8a   :  { %854 = vmatpush.msrb.mxu0 %v1953_v12 }
  0x8b   :  { %891 = vmatpush.msrb.mxu1 %v890_v0 }
  0x8d   :  { %897 = vmatpush.msrb.mxu1 %v896_v32  ;;  %v815_v32 = vld [vmem:[#allocation8 + $0x10] sm:$0xff] }
  0x8e   :  { %v859_v1 = vand.u32 4294901760, %v815_v32 }
  0xb6   :  { %v147_v23 = vpop.f32.mrf.mxu0 }
  0xb7   :  { %v148_v16 = vadd.f32 %v1201_v15, %v147_v23  ;;  %v1960_v15 = vsub.f32 %v820_v56, %v1949_v60  ;;  %v1964_v23 = vsub.f32 %v819_v58, %v1951_v31 }
  0xb9   :  { %v930_v25 = vand.u32 4294901760, %v1964_v23 }
  0xba   :  { %v248_v18 = vpop.f32.mrf.mxu1  ;;  %v341_v59 = vpop.f32.mrf.mxu3 }
  0xbb   :  { %v249_v26 = vadd.f32 %v248_v18, %v148_v16  ;;  %v1966_v16 = vand.u32 4294901760, %v817_v20  ;;  %v931_v49 = vsub.f32 %v1964_v23, %v930_v25 }
  0xbc   :  { %v302_v55 = vpop.f32.mrf.mxu2 }
  0xbd   :  { %v303_v27 = vadd.f32 %v302_v55, %v249_v26  ;;  %v902_v26 = vand.u32 4294901760, %v901_v54  ;;  %v913_v55 = vsub.f32 %v1924_v21, %v912_v33  ;;  %856 = vmatpush.msrb.mxu0 %v1966_v16 }
  0xbf   :  { %v342_v61 = vadd.f32 %v341_v59, %v303_v27  ;;  %v924_v27 = vand.u32 4294901760, %v1960_v15  ;;  %v1974_v59 = vsub.f32 %v818_v52, %v1953_v12  ;;  %903 = vmatpush.msrb.mxu1 %v902_v26  ;;  %v914_v41 = vand.u32 4294901760, %v913_v55  ;;  %v813_v26 = vld [vmem:[#allocation8] sm:$0xff] }
  0xc0   :  { %v932_v52 = vand.u32 4294901760, %v931_v49 }
  0xc1   :  { %v925_v9 = vsub.f32 %v1960_v15, %v924_v27  ;;  %v936_v45 = vand.u32 4294901760, %v1974_v59  ;;  %909 = vmatpush.msrb.mxu1 %v908_v6  ;;  %v863_v6 = vand.u32 4294901760, %v813_v26 }
  0xc3   :  { %915 = vmatpush.msrb.mxu1 %v914_v41  ;;  %v926_v46 = vand.u32 4294901760, %v925_v9  ;;  %v937_v56 = vsub.f32 %v1974_v59, %v936_v45  ;;  %v965_v41 = vsub.f32 %v813_v26, %v863_v6 }
  0xc5   :  { %v938_v2 = vand.u32 4294901760, %v937_v56 }
  0xd2   :  { %v410_v62 = vpop.f32.mrf.mxu0 }
  0xd3   :  { %v411_v39 = vadd.f32 %v410_v62, %v342_v61  ;;  %v1976_v61 = vand.u32 4294901760, %v816_v34 }
  0xd5   :  { %v1993_v57 = vsub.f32 %v816_v34, %v1976_v61  ;;  %858 = vmatpush.msrb.mxu0 %v1976_v61  ;;  %v814_v34 = vld [vmem:[#allocation8 + $0x8] sm:$0xff] }
  0xd7   :  { %v948_v58 = vand.u32 4294901760, %v1993_v57  ;;  %860 = vmatpush.msrb.mxu0 %v859_v1 }
  0xd9   :  { %v949_v54 = vsub.f32 %v1993_v57, %v948_v58 }
  0xda   :  { %v447_v17 = vpop.f32.mrf.mxu1 }
  0xdb   :  { %v448_v14 = vadd.f32 %v447_v17, %v411_v39  ;;  %v1984_v39 = vsub.f32 %v817_v20, %v1966_v16  ;;  %v950_v0 = vand.u32 4294901760, %v949_v54 }
  0xdd   :  { %1204 = vtanh.f32 %v448_v14  ;;  %v920_v14 = vand.u32 4294901760, %v919_v4  ;;  %v942_v63 = vand.u32 4294901760, %v1984_v39 }
  0xdf   :  { %921 = vmatpush.msrb.mxu1 %v920_v14  ;;  %v943_v50 = vsub.f32 %v1984_v39, %v942_v63  ;;  %v966_v14 = vand.u32 4294901760, %v965_v41 }
  0xe1   :  { %927 = vmatpush.msrb.mxu1 %v926_v46  ;;  %v944_v20 = vand.u32 4294901760, %v943_v50 }
  0xe3   :  { %v1205_v35 = vpop.eup %1204  ;;  %933 = vmatpush.msrb.mxu1 %v932_v52 }
  0xe4   :  { %v503_v18 = vand.u32 4294901760, %v1205_v35 }
  0xe5   :  { %939 = vmatpush.msrb.mxu1 %v938_v2 }
  0xe6   :  { %609 = vmatmul.f32.vlgmr.msrb.gmra.mxu3 %v503_v18  ;;  %v504_v62 = vsub.f32 %v1205_v35, %v503_v18  ;;  %v953_v35 = vsub.f32 %v815_v32, %v859_v1 }
  0xe7   :  { %1030 = vmatpush.msrb.mxu3 %v1882_v7  ;;  %945 = vmatpush.msrb.mxu1 %v944_v20 }
  0xe8   :  { %663 = vmatmul.f32.vlgmr.msra.gmra.mxu0 %v504_v62  ;;  %v505_v30 = vand.u32 4294901760, %v504_v62  ;;  %v954_v55 = vand.u32 4294901760, %v953_v35 }
  0xe9   :  { %1032 = vmatpush.msrb.mxu3 %v1884_v13  ;;  %951 = vmatpush.msrb.mxu1 %v950_v0 }
  0xea   :  { %702 = vmatmul.f32.vlgmr.msra.gmra.mxu1 %v505_v30  ;;  %v506_v17 = vsub.f32 %v504_v62, %v505_v30  ;;  %v955_v4 = vsub.f32 %v953_v35, %v954_v55 }
  0xeb   :  { %1034 = vmatpush.msrb.mxu3 %v1886_v29 }
  0xec   :  { %v507_v28 = vand.u32 4294901760, %v506_v17  ;;  %v956_v9 = vand.u32 4294901760, %v955_v4 }
  0xed   :  { %1036 = vmatpush.msrb.mxu3 %v1888_v43 }
  0xee   :  { %508 = vmatmul.f32.vlgmr.msrb.gmra.mxu2 %v507_v28  ;;  %808 = vmatmul.f32.vlgmr.msra.gmra.mxu3 %v503_v18  ;;  %v967_v28 = vsub.f32 %v965_v41, %v966_v14 }
  0xef   :  { %977 = vmatpush.msrb.mxu2 %v1895_v19  ;;  %1038 = vmatpush.msrb.mxu3 %v1890_v24 }
  0xf0   :  { %957 = vmatpush.msrb.mxu1 %v956_v9  ;;  %v968_v46 = vand.u32 4294901760, %v967_v28 }
  0xf1   :  { %980 = vmatpush.msrb.mxu2 %v1898_v11  ;;  %1040 = vmatpush.msrb.mxu3 %v1892_v10 }
  0xf3   :  { %983 = vmatpush.msrb.mxu2 %v1901_v51  ;;  %1042 = vmatpush.msrb.mxu3 %v1904_v37 }
  0xf5   :  { %986 = vmatpush.msrb.mxu2 %v1907_v38  ;;  %1044 = vmatpush.msrb.mxu3 %v1915_v47 }
  0xf6   :  { %771 = vmatmul.f32.vlgmr.msra.gmra.mxu2 %v503_v18  ;;  %v861_v18 = vand.u32 4294901760, %v814_v34 }
  0xf7   :  { %989 = vmatpush.msrb.mxu2 %v1910_v48  ;;  %1046 = vmatpush.msrb.mxu3 %v1949_v60 }
  0xf8   :  { %v959_v62 = vsub.f32 %v814_v34, %v861_v18  ;;  %862 = vmatpush.msrb.mxu0 %v861_v18 }
  0xf9   :  { %992 = vmatpush.msrb.mxu2 %v1913_v22  ;;  %1048 = vmatpush.msrb.mxu3 %v1951_v31 }
  0xfa   :  { %v960_v30 = vand.u32 4294901760, %v959_v62  ;;  %864 = vmatpush.msrb.mxu0 %v863_v6 }
  0xfb   :  { %995 = vmatpush.msrb.mxu2 %v1924_v21  ;;  %1050 = vmatpush.msrb.mxu3 %v1953_v12  ;;  %v1203_v21 = vld [vmem:[%s2092_s6] ss:$0 sm:$0xff] }
  0xfc   :  { %1071 = vmatpush.msra.mxu0 %v876_v53  ;;  %v961_v17 = vsub.f32 %v959_v62, %v960_v30 }
  0xfd   :  { %998 = vmatpush.msrb.mxu2 %v1942_v8  ;;  %1052 = vmatpush.msrb.mxu3 %v1966_v16 }
  0xfe   :  { %1075 = vmatpush.msra.mxu0 %v882_v3  ;;  %v962_v49 = vand.u32 4294901760, %v961_v17 }
  0xff   :  { %1001 = vmatpush.msrb.mxu2 %v1960_v15  ;;  %1054 = vmatpush.msrb.mxu3 %v1976_v61 }
 0x100   :  { %1079 = vmatpush.msra.mxu0 %v888_v42  ;;  %963 = vmatpush.msrb.mxu1 %v962_v49 }
 0x101   :  { %1004 = vmatpush.msrb.mxu2 %v1964_v23  ;;  %1056 = vmatpush.msrb.mxu3 %v859_v1 }
 0x102   :  { %1083 = vmatpush.msra.mxu0 %v894_v5  ;;  %969 = vmatpush.msrb.mxu1 %v968_v46 }
 0x103   :  { %1007 = vmatpush.msrb.mxu2 %v1974_v59  ;;  %1058 = vmatpush.msrb.mxu3 %v861_v18 }
 0x104   :  { %1138 = vmatpush.msra.mxu1 %v1882_v7  ;;  %1087 = vmatpush.msra.mxu0 %v900_v44  ;;  %v1202_v7 = vld [vmem:[%s2090_s4] ss:$0 sm:$0xff] }
 0x105   :  { %1010 = vmatpush.msrb.mxu2 %v1984_v39  ;;  %1060 = vmatpush.msrb.mxu3 %v863_v6 }
 0x106   :  { %1140 = vmatpush.msra.mxu1 %v1884_v13  ;;  %1091 = vmatpush.msra.mxu0 %v906_v40 }
 0x107   :  { %1013 = vmatpush.msrb.mxu2 %v1993_v57 }
 0x108   :  { %1142 = vmatpush.msra.mxu1 %v1886_v29  ;;  %1095 = vmatpush.msra.mxu0 %v912_v33 }
 0x109   :  { %1016 = vmatpush.msrb.mxu2 %v953_v35 }
 0x10a   :  { %1144 = vmatpush.msra.mxu1 %v1888_v43  ;;  %1099 = vmatpush.msra.mxu0 %v918_v36 }
 0x10b   :  { %1019 = vmatpush.msrb.mxu2 %v959_v62 }
 0x10c   :  { %1146 = vmatpush.msra.mxu1 %v1890_v24  ;;  %1103 = vmatpush.msra.mxu0 %v924_v27 }
 0x10d   :  { %1022 = vmatpush.msrb.mxu2 %v965_v41 }
 0x10e   :  { %1148 = vmatpush.msra.mxu1 %v1892_v10  ;;  %1107 = vmatpush.msra.mxu0 %v930_v25 }
 0x110   :  { %1150 = vmatpush.msra.mxu1 %v1904_v37  ;;  %1111 = vmatpush.msra.mxu0 %v936_v45 }
 0x112   :  { %1152 = vmatpush.msra.mxu1 %v1915_v47  ;;  %1115 = vmatpush.msra.mxu0 %v942_v63 }
 0x114   :  { %1154 = vmatpush.msra.mxu1 %v1949_v60  ;;  %1119 = vmatpush.msra.mxu0 %v948_v58 }
 0x116   :  { %1156 = vmatpush.msra.mxu1 %v1951_v31  ;;  %1123 = vmatpush.msra.mxu0 %v954_v55 }
 0x118   :  { %1158 = vmatpush.msra.mxu1 %v1953_v12  ;;  %1127 = vmatpush.msra.mxu0 %v960_v30 }
 0x11a   :  { %1160 = vmatpush.msra.mxu1 %v1966_v16  ;;  %1131 = vmatpush.msra.mxu0 %v966_v14 }
 0x11c   :  { %1162 = vmatpush.msra.mxu1 %v1976_v61 }
 0x11e   :  { %1164 = vmatpush.msra.mxu1 %v859_v1 }
 0x120   :  { %1166 = vmatpush.msra.mxu1 %v861_v18 }
 0x122   :  { %1168 = vmatpush.msra.mxu1 %v863_v6 }
 0x165   :  { %v664_v10 = vpop.f32.mrf.mxu0 }
 0x167   :  { %v703_v11 = vpop.f32.mrf.mxu1 }
 0x169   :  { %v610_v13 = vpop.f32.mrf.mxu3 }
 0x171   :  { %v509_v29 = vpop.f32.mrf.mxu2  ;;  %v809_v48 = vpop.f32.mrf.mxu3 }
 0x172   :  { %v510_v43 = vadd.f32 %v1202_v7, %v509_v29 }
 0x174   :  { %v611_v24 = vadd.f32 %v610_v13, %v510_v43 }
 0x176   :  { %v665_v19 = vadd.f32 %v664_v10, %v611_v24 }
 0x178   :  { %v704_v51 = vadd.f32 %v703_v11, %v665_v19 }
 0x179   :  { %v772_v37 = vpop.f32.mrf.mxu2 }
 0x17a   :  { %v773_v38 = vadd.f32 %v772_v37, %v704_v51 }
 0x17c   :  { %v810_v22 = vadd.f32 %v809_v48, %v773_v38 }
 0x17e   :  { %v812_v47 = vmax.f32 %v810_v22, 0.0 }
 0x180   :  { %v865_v53 = vand.u32 4294901760, %v812_v47 }
 0x182   :  { %v866_v3 = vsub.f32 %v812_v47, %v865_v53  ;;  %971 = vmatmul.f32.vlgmr.msrb.gmra.mxu1 %v865_v53 }
 0x184   :  { %1025 = vmatmul.f32.vlgmr.msrb.gmra.mxu2 %v866_v3  ;;  %v867_v42 = vand.u32 4294901760, %v866_v3 }
 0x186   :  { %1064 = vmatmul.f32.vlgmr.msrb.gmra.mxu3 %v867_v42  ;;  %v868_v5 = vsub.f32 %v866_v3, %v867_v42 }
 0x188   :  { %v869_v44 = vand.u32 4294901760, %v868_v5 }
 0x18a   :  { %870 = vmatmul.f32.vlgmr.msrb.gmra.mxu0 %v869_v44  ;;  %1170 = vmatmul.f32.vlgmr.msra.gmra.mxu1 %v865_v53 }
 0x192   :  { %1133 = vmatmul.f32.vlgmr.msra.gmra.mxu0 %v865_v53 }
 0x1ff   :  { %v972_v40 = vpop.f32.mrf.mxu1 }
 0x207   :  { %v871_v8 = vpop.f32.mrf.mxu0  ;;  %v1026_v31 = vpop.f32.mrf.mxu2 }
 0x208   :  { %v872_v33 = vadd.f32 %v1203_v21, %v871_v8  ;;  %v1171_v27 = vpop.f32.mrf.mxu1 }
 0x209   :  { %v1065_v36 = vpop.f32.mrf.mxu3 }
 0x20a   :  { %v973_v60 = vadd.f32 %v972_v40, %v872_v33 }
 0x20c   :  { %v1027_v12 = vadd.f32 %v1026_v31, %v973_v60 }
 0x20e   :  { %v1066_v15 = vadd.f32 %v1065_v36, %v1027_v12 }
 0x20f   :  { %v1134_v23 = vpop.f32.mrf.mxu0 }
 0x210   :  { %v1135_v16 = vadd.f32 %v1134_v23, %v1066_v15 }
 0x212   :  { %v1172_v59 = vadd.f32 %v1171_v27, %v1135_v16 }
 0x214   :  { %1174 = vst [vmem:[#allocation10] sm:$0xff] %v1172_v59 }
 0x215   :  { %1185 = dma.vmem_to_hbm [thread:$0]  %s1181_s24, 128, %s1183_s27, [#allocation4]  }
 0x216   :  { %1332 = dma.done.wait [#allocation4], 128  }
 0x217   :  { %1333 = vsyncadd [#allocation4], 4294967168 }
 0x218   :  { %1190 = vsyncpa [#allocation3], 1 }
 0x219   :  { %1191 = vsyncpa [#allocation6], 1 }
 0x21a   :  { %1192 = vsyncpa [#allocation9], 1 }
 0x21b   :  { %1193 = vsyncpa [#allocation4], 1 }

</bundles_post_ra>
